<compile_context>
chip_gen: v6e
topology: v6e:2x2x1
jax: 0.10.0
libtpu: 0.0.40
codegen_flags: <defaults>
</compile_context>

<pallas_src>
import functools

import jax
import jax.numpy as jnp
from jax.experimental import pallas as pl
from jax.experimental.pallas import tpu as pltpu


def _round_up(a: int, b: int) -> int:
    return -(-a // b) * b


def _vmem_capacity_bytes() -> int:
    """Per-TensorCore VMEM capacity (64 MiB on v7x, 128 MiB on v5e/v6e)."""
    try:
        cap = getattr(pltpu.get_tpu_info(), "vmem_capacity_bytes", None)
        if cap:
            return int(cap)
    except Exception:
        pass
    return 128 << 20


def _generator_kernel(x_ref, w_ref, b_ref, o_ref, h_ref, m_ref, l_ref, *acc,
                      use_acc: bool):
    """One (row_tile, vocab_tile) grid step with an online log_softmax."""
    acc_ref = acc[0] if use_acc else o_ref      # f32 logits live here
    j = pl.program_id(1)
    nv = pl.num_programs(1)
    tn = w_ref.shape[1]
    n_vt = o_ref.shape[1] // tn                 # static

    @pl.when(j == 0)
    def _():
        # tanh once per row tile; cached in the matmul input dtype (bf16 stays
        # bf16 so the MXU runs its native path; accumulation is still f32).
        h_ref[...] = jnp.tanh(x_ref[...].astype(jnp.float32)).astype(h_ref.dtype)
        m_ref[...] = jnp.full_like(m_ref, -jnp.inf)
        l_ref[...] = jnp.zeros_like(l_ref)

    logits = jnp.dot(h_ref[...], w_ref[...],
                     preferred_element_type=jnp.float32) + b_ref[...]

    col = pl.multiple_of(j * tn, 128)
    acc_ref[:, pl.ds(col, tn)] = logits.astype(acc_ref.dtype)

    # Online softmax statistics — overlaps with the next tile's matmul.
    m_prev = m_ref[...]
    m_new = jnp.maximum(m_prev, jnp.max(logits, axis=1, keepdims=True))
    l_ref[...] = (jnp.exp(m_prev - m_new) * l_ref[...]
                  + jnp.sum(jnp.exp(logits - m_new), axis=1, keepdims=True))
    m_ref[...] = m_new

    @pl.when(j == nv - 1)
    def _():
        lse = m_ref[...] + jnp.log(l_ref[...])          # (tm, 1) f32

        def finalize(jj, carry):
            c = pl.multiple_of(jj * tn, 128)
            sl = pl.ds(c, tn)
            o_ref[:, sl] = (acc_ref[:, sl].astype(jnp.float32)
                            - lse).astype(o_ref.dtype)
            return carry

        # Visible loop bounds live ranges for many vocab tiles; fully unrolled
        # for small tile counts (LLO scheduler visibility).
        jax.lax.fori_loop(0, n_vt, finalize, 0, unroll=n_vt <= 8)


@functools.partial(jax.jit,
                   static_argnames=("block_rows", "block_cols", "out_dtype"))
def generator_forward(x, weight_t, bias, *, block_rows=512, block_cols=None,
                      out_dtype=None):
    """log_softmax(tanh(x) @ weight_t + bias, axis=-1).

    x        : (..., 2H)
    weight_t : (2H, V)   (torch Linear weight (V, 2H), transposed once outside)
    bias     : (V,)
    out_dtype: output dtype, defaults to x.dtype (bf16 in -> bf16 log-probs,
               which halves the HBM writeback; pass jnp.float32 for full-
               precision log-probs).
    Note: tanh(x) is cast to weight_t.dtype before the matmul, so f32 x with a
    bf16 weight intentionally runs the MXU in bf16 (f32 accumulation).
    """
    in_features = x.shape[-1]
    if weight_t.shape[0] != in_features:
        raise ValueError("weight_t must have shape (in_features, vocab)")
    vocab = weight_t.shape[1]
    lead_shape = x.shape[:-1]
    out_dtype = jnp.dtype(x.dtype if out_dtype is None else out_dtype)

    x2d = x.reshape(-1, in_features)
    m_rows = x2d.shape[0]

    xb = x2d.dtype.itemsize
    wb = weight_t.dtype.itemsize
    ob = out_dtype.itemsize

    # --- generation-aware VMEM constants -----------------------------------
    vmem_cap = _vmem_capacity_bytes()       # 64 MiB/TC on v7x, 128 on v5e/v6e
    budget = (vmem_cap * 3) // 4            # working budget (~48 / ~96 MiB)
    headroom = 8 << 20                      # compiler temporaries
    resident_thresh = vmem_cap // 5         # ~12.8 MiB v7x, ~25.6 MiB v5e/v6e
    multi_core = vmem_cap <= (64 << 20)     # v7x-like: 2 TCs share the chip

    # --- vocab (lane) tiling: multiple of 128; a single full-V tile when the
    #     weight comfortably fits VMEM (then it stays resident). ---------------
    v128 = _round_up(vocab, 128)
    if block_cols is None:
        block_cols = v128 if in_features * v128 * wb <= resident_thresh else 2048
    tn = min(_round_up(block_cols, 128), v128)
    v_pad = _round_up(vocab, tn)
    n_vt = v_pad // tn
    resident = n_vt == 1

    # f32 outputs accumulate straight into the resident output block; narrower
    # out dtypes keep an exact f32 scratch accumulator for the lse subtraction.
    use_acc = out_dtype != jnp.dtype(jnp.float32)

    # --- row (sublane) tiling: big tiles keep the MXU M-dim full and cut the
    #     number of weight re-reads; shrink only as a last resort. ------------
    row_align = 8 if xb >= 4 else (16 if xb == 2 else 32)
    tm = _round_up(min(block_rows, _round_up(m_rows, row_align)), row_align)

    # v7x: make sure the "parallel" row axis has >= 2 tiles so both cores work.
    if multi_core and m_rows > row_align and -(-m_rows // tm) == 1:
        tm = _round_up(-(-m_rows // 2), row_align)

    def footprint(tm_):
        return (2 * tm_ * in_features * xb                         # x (dbl buf)
                + (1 if resident else 2) * in_features * tn * wb   # weight
                + (1 if resident else 2) * 4 * tn                  # bias
                + 2 * tm_ * v_pad * ob                             # output
                + (tm_ * v_pad * 4 if use_acc else 0)              # f32 acc
                + tm_ * in_features * wb                           # tanh cache
                + 4 * tm_ * 4)                                     # m_i, l_i

    while tm > row_align and footprint(tm) > budget - headroom:
        tm = max(_round_up(tm // 2, row_align), row_align)

    m_pad = _round_up(m_rows, tm)
    n_mt = m_pad // tm

    # --- padding (no-ops when shapes are already aligned) --------------------
    if m_pad != m_rows:
        x2d = jnp.pad(x2d, ((0, m_pad - m_rows), (0, 0)))
    w = weight_t
    b = bias.astype(jnp.float32)
    if v_pad != vocab:
        w = jnp.pad(w, ((0, 0), (0, v_pad - vocab)))
        # Padded columns get a huge negative bias -> exp() underflows to 0 ->
        # no effect on the log_softmax of the real vocab entries.
        b = jnp.pad(b, (0, v_pad - vocab), constant_values=-1e30)
    b = b.reshape(1, v_pad)

    if resident:
        # Grid-invariant weight/bias (single vocab tile): single-buffer them so
        # the resident weight does not pay 2x VMEM for pointless double
        # buffering.
        w_spec = pl.BlockSpec((in_features, tn), lambda i, j: (0, j),
                              pipeline_mode=pl.Buffered(1))
        b_spec = pl.BlockSpec((1, tn), lambda i, j: (0, j),
                              pipeline_mode=pl.Buffered(1))
    else:
        w_spec = pl.BlockSpec((in_features, tn), lambda i, j: (0, j))
        b_spec = pl.BlockSpec((1, tn), lambda i, j: (0, j))

    # Clamp below the physical per-core capacity (64 MiB on v7x).
    vmem_limit = int(min(max(footprint(tm) + headroom, 32 << 20),
                         vmem_cap - (4 << 20)))

    cost = pl.CostEstimate(
        flops=2 * m_pad * in_features * v_pad + 5 * m_pad * v_pad,
        transcendentals=m_pad * in_features + 2 * m_pad * v_pad,
        bytes_accessed=(m_pad * in_features * xb
                        + in_features * v_pad * wb * (1 if resident else n_mt)
                        + 4 * v_pad
                        + m_pad * v_pad * ob),
    )

    scratch = [
        pltpu.VMEM((tm, in_features), w.dtype),   # tanh(x) cache
        pltpu.VMEM((tm, 1), jnp.float32),         # running max  m_i
        pltpu.VMEM((tm, 1), jnp.float32),         # running sum  l_i
    ]
    if use_acc:
        scratch.append(pltpu.VMEM((tm, v_pad), jnp.float32))   # f32 logits

    out = pl.pallas_call(
        functools.partial(_generator_kernel, use_acc=use_acc),
        out_shape=jax.ShapeDtypeStruct((m_pad, v_pad), out_dtype),
        grid_spec=pltpu.PrefetchScalarGridSpec(
            num_scalar_prefetch=0,
            grid=(n_mt, n_vt),
            in_specs=[
                pl.BlockSpec((tm, in_features), lambda i, j: (i, 0)),
                w_spec,
                b_spec,
            ],
            out_specs=pl.BlockSpec((tm, v_pad), lambda i, j: (i, 0)),
            scratch_shapes=scratch,
        ),
        compiler_params=pltpu.CompilerParams(
            dimension_semantics=("parallel", "arbitrary"),
            vmem_limit_bytes=vmem_limit),
        cost_estimate=cost,
    )(x2d, w, b)

    out = out[:m_rows, :vocab]
    return out.reshape(*lead_shape, vocab)


if __name__ == "__main__":
    # Small shapes consistent with the module: hidden=16 -> in_features=32,
    # vocab=128, batch=2, seq=8.
    hidden_size = 16
    vocab_size = 128
    batch, seq = 2, 8
    in_features = 2 * hidden_size

    key = jax.random.PRNGKey(0)
    kx, kw, kb = jax.random.split(key, 3)

    bound = 1.0 / (in_features ** 0.5)
    weight = jax.random.uniform(kw, (vocab_size, in_features),
                                minval=-bound, maxval=bound, dtype=jnp.float32)
    bias = jax.random.uniform(kb, (vocab_size,),
                              minval=-bound, maxval=bound, dtype=jnp.float32)
    x = jax.random.normal(kx, (batch, seq, in_features), dtype=jnp.float32)

    # One-time layout prep OUTSIDE the jitted hot path (torch stores (V, 2H)).
    weight_t = jnp.asarray(weight.T)

    ref = jax.nn.log_softmax(jnp.tanh(x) @ weight.T + bias, axis=-1)

    # 1) f32, aligned shapes, single resident (single-buffered) vocab tile,
    #    logits accumulated directly in the f32 output block.
    out = jax.block_until_ready(generator_forward(x, weight_t, bias))
    assert out.shape == (batch, seq, vocab_size)
    assert jnp.max(jnp.abs(out - ref)) < 1e-4

    # 2) Unaligned rows/vocab + multi-tile vocab axis: exercises padding, the
    #    online-softmax accumulation across vocab tiles, and the fori epilogue.
    v2 = 200
    x2 = jax.random.normal(jax.random.PRNGKey(1), (3, 5, in_features),
                           dtype=jnp.float32)
    w2 = jax.random.uniform(jax.random.PRNGKey(2), (in_features, v2),
                            minval=-bound, maxval=bound, dtype=jnp.float32)
    b2 = jax.random.uniform(jax.random.PRNGKey(3), (v2,),
                            minval=-bound, maxval=bound, dtype=jnp.float32)
    out2 = jax.block_until_ready(generator_forward(x2, w2, b2, block_cols=128))
    ref2 = jax.nn.log_softmax(jnp.tanh(x2) @ w2 + b2, axis=-1)
    assert out2.shape == (3, 5, v2)
    assert jnp.max(jnp.abs(out2 - ref2)) < 1e-4

    # 3) bf16 operands on the MXU native path, bf16 log-probs out (default
    #    out_dtype = input dtype; exercises the f32 scratch-accumulator path).
    xb16 = x.astype(jnp.bfloat16)
    wb16 = weight_t.astype(jnp.bfloat16)
    out3 = jax.block_until_ready(generator_forward(xb16, wb16, bias))
    ref3 = jax.nn.log_softmax(
        jnp.dot(jnp.tanh(xb16.astype(jnp.float32)).astype(jnp.bfloat16), wb16,
                preferred_element_type=jnp.float32) + bias, axis=-1)
    assert out3.shape == (batch, seq, vocab_size)
    assert out3.dtype == jnp.bfloat16
    assert jnp.max(jnp.abs(out3.astype(jnp.float32) - ref3)) < 7e-2

    # 4) bf16 + multi-tile vocab: f32 accumulator scratch + online softmax +
    #    fori_loop finalize with a bf16 output cast.
    x4 = x2.astype(jnp.bfloat16)
    w4 = w2.astype(jnp.bfloat16)
    out4 = jax.block_until_ready(generator_forward(x4, w4, b2, block_cols=128))
    ref4 = jax.nn.log_softmax(
        jnp.dot(jnp.tanh(x4.astype(jnp.float32)).astype(jnp.bfloat16), w4,
                preferred_element_type=jnp.float32) + b2, axis=-1)
    assert out4.shape == (3, 5, v2)
    assert jnp.max(jnp.abs(out4.astype(jnp.float32) - ref4)) < 7e-2

    print("KERNEL_OK")
</pallas_src>

<mosaic_0001>
module attributes {stable_mosaic.version = 11 : i64} {
  func.func @_generator_kernel(%arg0: i32, %arg1: i32, %arg2: memref<16x32xf32, #tpu.memory_space<vmem>>, %arg3: memref<32x128xf32, #tpu.memory_space<vmem>>, %arg4: memref<1x128xf32, #tpu.memory_space<vmem>>, %arg5: memref<16x128xf32, #tpu.memory_space<vmem>>, %arg6: memref<16x32xf32, #tpu.memory_space<vmem>>, %arg7: memref<16x1xf32, #tpu.memory_space<vmem>>, %arg8: memref<16x1xf32, #tpu.memory_space<vmem>>) attributes {dimension_semantics = [#tpu.dimension_semantics<parallel>, #tpu.dimension_semantics<arbitrary>], iteration_bounds = array<i64: 1, 1>, scalar_prefetch = 0 : i64, scratch_operands = 3 : i64, tpu.core_type = #tpu.core_type<tc>, window_params = [{transform_indices = @transform_0, window_bounds = array<i64: 16, 32>}, {pipeline_mode = #tpu.pipeline_mode<synchronous>, transform_indices = @transform_1, window_bounds = array<i64: 32, 128>}, {pipeline_mode = #tpu.pipeline_mode<synchronous>, transform_indices = @transform_2, window_bounds = array<i64: 1, 128>}, {transform_indices = @transform_3, window_bounds = array<i64: 16, 128>}]} {
    %c0_i32 = arith.constant 0 : i32
    %0 = arith.cmpi eq, %arg1, %c0_i32 : i32
    %1 = arith.extui %0 : i1 to i32
    %c0_i32_0 = arith.constant 0 : i32
    %2 = arith.cmpi ne, %1, %c0_i32_0 : i32
    scf.if %2 {
      %c0_19 = arith.constant 0 : index
      %c0_20 = arith.constant 0 : index
      %32 = vector.load %arg2[%c0_19, %c0_20] : memref<16x32xf32, #tpu.memory_space<vmem>>, vector<16x32xf32>
      %33 = math.tanh %32 : vector<16x32xf32>
      %c0_21 = arith.constant 0 : index
      %c0_22 = arith.constant 0 : index
      %34 = vector.load %arg6[%c0_21, %c0_22] : memref<16x32xf32, #tpu.memory_space<vmem>>, vector<16x32xf32>
      tpu.vector_store %arg6[%c0_21, %c0_22], %33 {strides = array<i32>} : memref<16x32xf32, #tpu.memory_space<vmem>>, vector<16x32xf32>,
      %cst_23 = arith.constant 0xFF800000 : f32
      %35 = vector.broadcast %cst_23 : f32 to vector<16x1xf32>
      %c0_24 = arith.constant 0 : index
      %c0_25 = arith.constant 0 : index
      %36 = vector.load %arg7[%c0_24, %c0_25] : memref<16x1xf32, #tpu.memory_space<vmem>>, vector<16x1xf32>
      tpu.vector_store %arg7[%c0_24, %c0_25], %35 {strides = array<i32>} : memref<16x1xf32, #tpu.memory_space<vmem>>, vector<16x1xf32>,
      %cst_26 = arith.constant 0.000000e+00 : f32
      %37 = vector.broadcast %cst_26 : f32 to vector<16x1xf32>
      %c0_27 = arith.constant 0 : index
      %c0_28 = arith.constant 0 : index
      %38 = vector.load %arg8[%c0_27, %c0_28] : memref<16x1xf32, #tpu.memory_space<vmem>>, vector<16x1xf32>
      tpu.vector_store %arg8[%c0_27, %c0_28], %37 {strides = array<i32>} : memref<16x1xf32, #tpu.memory_space<vmem>>, vector<16x1xf32>,
    } else {
    }
    %c0 = arith.constant 0 : index
    %c0_1 = arith.constant 0 : index
    %3 = vector.load %arg6[%c0, %c0_1] : memref<16x32xf32, #tpu.memory_space<vmem>>, vector<16x32xf32>
    %c0_2 = arith.constant 0 : index
    %c0_3 = arith.constant 0 : index
    %4 = vector.load %arg3[%c0_2, %c0_3] : memref<32x128xf32, #tpu.memory_space<vmem>>, vector<32x128xf32>
    %cst = arith.constant dense<0.000000e+00> : vector<16x128xf32>
    %5 = tpu.matmul %3, %4, %cst {dimension_numbers = #tpu.dot_dimension_numbers<[1], [0], [0], [1], [0, 0, 1, 1], [], []>} : vector<16x32xf32>, vector<32x128xf32>, vector<16x128xf32> -> vector<16x128xf32>
    %c0_4 = arith.constant 0 : index
    %c0_5 = arith.constant 0 : index
    %6 = vector.load %arg4[%c0_4, %c0_5] : memref<1x128xf32, #tpu.memory_space<vmem>>, vector<1x128xf32>
    %7 = vector.broadcast %6 : vector<1x128xf32> to vector<16x128xf32>
    %8 = arith.addf %5, %7 : vector<16x128xf32>
    %c128_i32 = arith.constant 128 : i32
    %9 = arith.muli %arg1, %c128_i32 : i32
    %10 = tpu.assume_multiple %9, 128 : i32
    %c0_6 = arith.constant 0 : index
    %11 = arith.index_cast %10 : i32 to index
    %12 = vector.load %arg5[%c0_6, %11] : memref<16x128xf32, #tpu.memory_space<vmem>>, vector<16x128xf32>
    tpu.vector_store %arg5[%c0_6, %11], %8 {strides = array<i32>} : memref<16x128xf32, #tpu.memory_space<vmem>>, vector<16x128xf32>,
    %c0_7 = arith.constant 0 : index
    %c0_8 = arith.constant 0 : index
    %13 = vector.load %arg7[%c0_7, %c0_8] : memref<16x1xf32, #tpu.memory_space<vmem>>, vector<16x1xf32>
    %cst_9 = arith.constant dense<0xFF800000> : vector<16xf32>
    %14 = vector.multi_reduction <maximumf>, %8, %cst_9 [1] : vector<16x128xf32> to vector<16xf32>
    %15 = vector.shape_cast %14 : vector<16xf32> to vector<16x1xf32>
    %16 = arith.maximumf %13, %15 : vector<16x1xf32>
    %17 = arith.subf %13, %16 : vector<16x1xf32>
    %18 = math.exp %17 : vector<16x1xf32>
    %c0_10 = arith.constant 0 : index
    %c0_11 = arith.constant 0 : index
    %19 = vector.load %arg8[%c0_10, %c0_11] : memref<16x1xf32, #tpu.memory_space<vmem>>, vector<16x1xf32>
    %20 = arith.mulf %18, %19 : vector<16x1xf32>
    %21 = vector.broadcast %16 : vector<16x1xf32> to vector<16x128xf32>
    %22 = arith.subf %8, %21 : vector<16x128xf32>
    %23 = math.exp %22 : vector<16x128xf32>
    %cst_12 = arith.constant dense<0.000000e+00> : vector<16xf32>
    %24 = vector.multi_reduction <add>, %23, %cst_12 [1] : vector<16x128xf32> to vector<16xf32>
    %25 = vector.shape_cast %24 : vector<16xf32> to vector<16x1xf32>
    %26 = arith.addf %20, %25 : vector<16x1xf32>
    %c0_13 = arith.constant 0 : index
    %c0_14 = arith.constant 0 : index
    %27 = vector.load %arg8[%c0_13, %c0_14] : memref<16x1xf32, #tpu.memory_space<vmem>>, vector<16x1xf32>
    tpu.vector_store %arg8[%c0_13, %c0_14], %26 {strides = array<i32>} : memref<16x1xf32, #tpu.memory_space<vmem>>, vector<16x1xf32>,
    %c0_15 = arith.constant 0 : index
    %c0_16 = arith.constant 0 : index
    %28 = vector.load %arg7[%c0_15, %c0_16] : memref<16x1xf32, #tpu.memory_space<vmem>>, vector<16x1xf32>
    tpu.vector_store %arg7[%c0_15, %c0_16], %16 {strides = array<i32>} : memref<16x1xf32, #tpu.memory_space<vmem>>, vector<16x1xf32>,
    %c0_i32_17 = arith.constant 0 : i32
    %29 = arith.cmpi eq, %arg1, %c0_i32_17 : i32
    %30 = arith.extui %29 : i1 to i32
    %c0_i32_18 = arith.constant 0 : i32
    %31 = arith.cmpi ne, %30, %c0_i32_18 : i32
    scf.if %31 {
      %c0_19 = arith.constant 0 : index
      %c0_20 = arith.constant 0 : index
      %32 = vector.load %arg7[%c0_19, %c0_20] : memref<16x1xf32, #tpu.memory_space<vmem>>, vector<16x1xf32>
      %c0_21 = arith.constant 0 : index
      %c0_22 = arith.constant 0 : index
      %33 = vector.load %arg8[%c0_21, %c0_22] : memref<16x1xf32, #tpu.memory_space<vmem>>, vector<16x1xf32>
      %34 = math.log %33 : vector<16x1xf32>
      %35 = arith.addf %32, %34 : vector<16x1xf32>
      %c0_i32_23 = arith.constant 0 : i32
      %c128_i32_24 = arith.constant 128 : i32
      %36 = arith.muli %c0_i32_23, %c128_i32_24 : i32
      %37 = tpu.assume_multiple %36, 128 : i32
      %c0_25 = arith.constant 0 : index
      %38 = arith.index_cast %37 : i32 to index
      %39 = vector.load %arg5[%c0_25, %38] : memref<16x128xf32, #tpu.memory_space<vmem>>, vector<16x128xf32>
      %40 = vector.broadcast %35 : vector<16x1xf32> to vector<16x128xf32>
      %41 = arith.subf %39, %40 : vector<16x128xf32>
      %c0_26 = arith.constant 0 : index
      %42 = arith.index_cast %37 : i32 to index
      %43 = vector.load %arg5[%c0_26, %42] : memref<16x128xf32, #tpu.memory_space<vmem>>, vector<16x128xf32>
      tpu.vector_store %arg5[%c0_26, %42], %41 {strides = array<i32>} : memref<16x128xf32, #tpu.memory_space<vmem>>, vector<16x128xf32>,
      %c1_i32 = arith.constant 1 : i32
    } else {
    }
    return
  }
  func.func @transform_0(%arg0: i32, %arg1: i32) -> (i32, i32) {
    %c0_i32 = arith.constant 0 : i32
    %c0_i32_0 = arith.constant 0 : i32
    return %arg0, %c0_i32 : i32, i32
  }
  func.func @transform_1(%arg0: i32, %arg1: i32) -> (i32, i32) {
    %c0_i32 = arith.constant 0 : i32
    %c0_i32_0 = arith.constant 0 : i32
    return %c0_i32, %arg1 : i32, i32
  }
  func.func @transform_2(%arg0: i32, %arg1: i32) -> (i32, i32) {
    %c0_i32 = arith.constant 0 : i32
    %c0_i32_0 = arith.constant 0 : i32
    return %c0_i32, %arg1 : i32, i32
  }
  func.func @transform_3(%arg0: i32, %arg1: i32) -> (i32, i32) {
    %c0_i32 = arith.constant 0 : i32
    %c0_i32_0 = arith.constant 0 : i32
    return %arg0, %c0_i32 : i32, i32
  }
}

</mosaic_0001>

<bundles_post_ra>
// kernel: generator_forward.1
= control target key start
LH: loop header
LB: loop body
LE: loop exit
PB: predicated region body
PF: predicated region fallthrough
CT: control target
= control target key end

     0   :  { %8 = vsyncpa [#allocation6], 0  ;;  %s432_s0 = inlined_call_operand.hbm [shape: f32[16,32], index: 0, kind: input, shape index: {}]   ;;  %s433_s1 = inlined_call_operand.hbm [shape: f32[32,128], index: 1, kind: input, shape index: {}]   ;;  %s434_s2 = inlined_call_operand.vmem [shape: f32[1,128], index: 2, kind: input, shape index: {}]   ;;  %s435_s3 = inlined_call_operand.hbm [shape: f32[16,128], index: 3, kind: output, shape index: {}]  }
   0x1   :  { %9 = vsyncpa [#allocation9], 0 }
   0x2   :  { %10 = vsyncpa [#allocation7], 0  ;;  %s365_s12 = smov [#allocation5]  }
   0x3   :  { %s16_s13 = sshll.u32 %s365_s12, 4  ;;  %s17_s13 = int_to_ptr.vmem [resolvable:$true] %s16_s13 }
   0x4   :  { %s307_s14 = scalar_lea.vmem %s17_s13, 256  ;;  %p312_p1 = scmp.lt.s32.totalorder %s17_s13, %s17_s13 }
   0x5   :  { %p308_p0 = scmp.ne.s32.totalorder %s17_s13, %s307_s14  ;;  %p313_p2 = scmp.lt.s32.totalorder %s307_s14, %s307_s14 }
   0x7   :  { %p314_p3 = por %p313_p2, %p312_p1 }
   0x9   :  { %p315_p4 = pnand %p314_p3, %p308_p0 }
   0xb   :  { %318 = shalt.err (!%p315_p4)
}
   0xc   :  { %s366_s15 = smov 128   ;;  %s367_s16 = smov 8  }
   0xd   :  { %22 = dma.hbm_to_vmem [thread:$0]  %s432_s0, 256, %s17_s13, [#allocation6], %s366_s15, %s366_s15, %s367_s16  }
   0xe   :  { %s368_s19 = smov [#allocation8]  }
   0xf   :  { %s28_s20 = sshll.u32 %s368_s19, 4  ;;  %s29_s20 = int_to_ptr.vmem [resolvable:$true] %s28_s20 }
  0x10   :  { %s327_s21 = scalar_lea.vmem %s29_s20, 512  ;;  %p332_p6 = scmp.lt.s32.totalorder %s29_s20, %s29_s20 }
  0x11   :  { %p328_p5 = scmp.ne.s32.totalorder %s29_s20, %s327_s21  ;;  %p333_p7 = scmp.lt.s32.totalorder %s327_s21, %s327_s21 }
  0x13   :  { %p334_p8 = por %p333_p7, %p332_p6 }
  0x15   :  { %p335_p9 = pnand %p334_p8, %p328_p5 }
  0x17   :  { %338 = shalt.err (!%p335_p9)
}
  0x18   :  { %34 = dma.hbm_to_vmem [thread:$0]  %s433_s1, 512, %s29_s20, [#allocation9], %s366_s15, %s366_s15, %s367_s16  }
  0x19   :  { %359 = dma.done.wait [#allocation6], 256  }
  0x1a   :  { %360 = vsyncadd [#allocation6], 4294967040 }
  0x1b   :  { %361 = dma.done.wait [#allocation9], 512  }
  0x1c   :  { %362 = vsyncadd [#allocation9], 4294966784  ;;  %v64_v0 = vld [vmem:[#allocation8 + $0x18] sm:$0xff]  ;;  %v63_v1 = vld [vmem:[#allocation8 + $0x10] sm:$0xff]  ;;  %vm51_vm0 = vcmask 261120   ;;  %vm54_vm1 = vcmask 7168  }
  0x1d   :  { %262 = vmatprep.subr.mxu0 %v64_v0  ;;  %v47_v2 = vld [vmem:[#allocation5] sm:$0xff]  ;;  %v48_v3 = vld [vmem:[#allocation5 + $0x8] sm:$0xff]  ;;  %v62_v4 = vld [vmem:[#allocation8 + $0x8] sm:$0xff]  ;;  %v369_v10 = vmov -inf   ;;  %v370_v16 = vmov 0   ;;  %v371_v17 = vmov 0.0  }
  0x1e   :  { %263 = vmatpush3.msra.mxu0 %v64_v0  ;;  %283 = vtanh.f32 %v47_v2  ;;  %v61_v5 = vld [vmem:[#allocation8] sm:$0xff]  ;;  %55 = vst.msk [vmem:[#allocation3] sm:$0xff] %vm54_vm1, %v369_v10  ;;  %56 = vst.msk [vmem:[#allocation3 + $0x8] sm:$0xff] %vm54_vm1, %v369_v10  ;;  %281 = vset.pattern.permute.xlu1 %v370_v16 }
  0x1f   :  { %264 = vmatprep.subr.mxu0 %v63_v1  ;;  %285 = vtanh.f32 %v48_v3  ;;  %v253_v12 = vld [vmem:[%s434_s2] ss:$0 sm:$0xff]  ;;  %282 = vset.pattern.permute.xlu0 %v370_v16  ;;  %57 = vst.msk [vmem:[#allocation4] sm:$0xff] %vm54_vm1, %v371_v17  ;;  %58 = vst.msk [vmem:[#allocation4 + $0x8] sm:$0xff] %vm54_vm1, %v371_v17  ;;  %s372_s2 = smov [#allocation10]  }
  0x20   :  { %265 = vmatpush3.msra.mxu0 %v63_v1  ;;  %s239_s24 = sshll.u32 %s372_s2, 4  ;;  %s240_s24 = int_to_ptr.vmem [resolvable:$true] %s239_s24 }
  0x21   :  { %266 = vmatprep.subr.mxu0 %v62_v4  ;;  %s339_s25 = scalar_lea.vmem %s240_s24, 256  ;;  %p344_p11 = scmp.lt.s32.totalorder %s240_s24, %s240_s24 }
  0x22   :  { %267 = vmatpush3.msra.mxu0 %v62_v4  ;;  %p340_p10 = scmp.ne.s32.totalorder %s240_s24, %s339_s25  ;;  %p345_p12 = scmp.lt.s32.totalorder %s339_s25, %s339_s25 }
  0x23   :  { %268 = vmatprep.subr.mxu0 %v61_v5 }
  0x24   :  { %269 = vmatpush3.msra.mxu0 %v61_v5  ;;  %p346_p13 = por %p345_p12, %p344_p11 }
  0x25   :  { %v160_v18 = vld [vmem:[#allocation3] sm:$0xff]  ;;  %v161_v21 = vld [vmem:[#allocation3 + $0x8] sm:$0xff] }
  0x26   :  { %v174_v37 = vld [vmem:[#allocation4] sm:$0xff]  ;;  %v175_v41 = vld [vmem:[#allocation4 + $0x8] sm:$0xff]  ;;  %p347_p0 = pnand %p346_p13, %p340_p10 }
  0x2b   :  { %v284_v6 = vpop.eup %283 }
  0x2c   :  { %v286_v7 = vpop.eup %285  ;;  %52 = vst.msk [vmem:[#allocation2] sm:$0xff] %vm51_vm0, %v284_v6 }
  0x2d   :  { %53 = vst.msk [vmem:[#allocation2 + $0x8] sm:$0xff] %vm51_vm0, %v286_v7 }
  0x33   :  { %v59_v8 = vld [vmem:[#allocation2] sm:$0xff] }
  0x34   :  { %270 = vmatprep.mubr.msk.f32.mxu0 %vm51_vm0, %v59_v8  ;;  %v60_v9 = vld [vmem:[#allocation2 + $0x8] sm:$0xff] }
  0x35   :  { %271 = vmatmul.mubr.msk.f32.vlgmr.msra.gmra.mxu0 %vm51_vm0, %v60_v9 }
  0xf5   :  { %v272_v11 = vpop.f32.mrf.mxu0 }
  0xf6   :  { %v413_v15 = vadd.f32 %v272_v11, %v253_v12 }
  0xf7   :  { %v145_v13 = vpop.f32.mrf.mxu0 }
  0xf8   :  { %v410_v14 = vadd.f32 %v253_v12, %v145_v13 }
  0xfa   :  { %162 = vmax.xlane.f32.xlu0 %v410_v14 }
  0xfe   :  { %164 = vmax.xlane.f32.xlu0 %v413_v15 }
 0x183   :  { %v163_v19 = vpop.xlane.xlu0 %162 }
 0x184   :  { %v166_v20 = vmax.f32 %v160_v18, %v163_v19 }
 0x186   :  { %v168_v22 = vsub.f32 %v160_v18, %v166_v20  ;;  %203 = vst.msk [vmem:[#allocation3] sm:$0xff] %vm54_vm1, %v166_v20  ;;  %180 = vperm.xlu1 %281, %v166_v20  }
 0x187   :  { %v165_v23 = vpop.xlane.xlu0 %164 }
 0x188   :  { %v167_v24 = vmax.f32 %v161_v21, %v165_v23  ;;  %v170_v34 = vmul.f32 1.442695, %v168_v22 }
 0x18a   :  { %v169_v25 = vsub.f32 %v161_v21, %v167_v24  ;;  %204 = vst.msk [vmem:[#allocation3 + $0x8] sm:$0xff] %vm54_vm1, %v167_v24  ;;  %185 = vperm.xlu1 %281, %v167_v24  }
 0x18c   :  { %v172_v35 = vmul.f32 1.442695, %v169_v25 }
 0x18d   :  { %v208_v50 = vld [vmem:[#allocation3] sm:$0xff] }
 0x191   :  { %v209_v54 = vld [vmem:[#allocation3 + $0x8] sm:$0xff] }
 0x201   :  { %v181_v26 = vpop.permute.xlu1 %180 }
 0x202   :  { %v188_v27 = vsub.f32 %v410_v14, %v181_v26 }
 0x204   :  { %v190_v28 = vmul.f32 1.442695, %v188_v27 }
 0x205   :  { %v186_v29 = vpop.permute.xlu1 %185 }
 0x206   :  { %287 = vpow2.f32 %v190_v28  ;;  %v189_v30 = vsub.f32 %v413_v15, %v186_v29 }
 0x208   :  { %v192_v31 = vmul.f32 1.442695, %v189_v30 }
 0x20a   :  { %289 = vpow2.f32 %v192_v31 }
 0x20b   :  { %291 = vpow2.f32 %v170_v34 }
 0x20c   :  { %293 = vpow2.f32 %v172_v35 }
 0x213   :  { %v288_v32 = vpop.eup %287 }
 0x214   :  { %194 = vadd.xlane.f32.xlu0 %v288_v32 }
 0x217   :  { %v290_v33 = vpop.eup %289 }
 0x218   :  { %196 = vadd.xlane.f32.xlu1 %v290_v33  ;;  %v292_v36 = vpop.eup %291 }
 0x219   :  { %v176_v38 = vmul.f32 %v292_v36, %v174_v37  ;;  %v294_v39 = vpop.eup %293 }
 0x21a   :  { %v177_v43 = vmul.f32 %v294_v39, %v175_v41 }
 0x29d   :  { %v195_v40 = vpop.xlane.xlu0 %194 }
 0x29e   :  { %v198_v42 = vadd.f32 %v195_v40, %v176_v38 }
 0x2a0   :  { %201 = vst.msk [vmem:[#allocation4] sm:$0xff] %vm54_vm1, %v198_v42 }
 0x2a1   :  { %v197_v44 = vpop.xlane.xlu1 %196 }
 0x2a2   :  { %v199_v45 = vadd.f32 %v197_v44, %v177_v43 }
 0x2a4   :  { %202 = vst.msk [vmem:[#allocation4 + $0x8] sm:$0xff] %vm54_vm1, %v199_v45 }
 0x2a7   :  { %v210_v46 = vld [vmem:[#allocation4] sm:$0xff] }
 0x2a8   :  { %295 = vlog2.f32 %v210_v46 }
 0x2ab   :  { %v211_v47 = vld [vmem:[#allocation4 + $0x8] sm:$0xff] }
 0x2ac   :  { %297 = vlog2.f32 %v211_v47 }
 0x2b5   :  { %v296_v48 = vpop.eup %295 }
 0x2b6   :  { %v213_v49 = vmul.f32 0.6931472, %v296_v48 }
 0x2b8   :  { %v216_v51 = vadd.f32 %v213_v49, %v208_v50 }
 0x2b9   :  { %v298_v52 = vpop.eup %297 }
 0x2ba   :  { %222 = vperm.xlu0 %282, %v216_v51   ;;  %v215_v53 = vmul.f32 0.6931472, %v298_v52 }
 0x2bc   :  { %v217_v55 = vadd.f32 %v215_v53, %v209_v54 }
 0x2be   :  { %227 = vperm.xlu1 %281, %v217_v55  }
 0x335   :  { %v223_v56 = vpop.permute.xlu0 %222 }
 0x336   :  { %v230_v57 = vsub.f32 %v410_v14, %v223_v56 }
 0x338   :  { %232 = vst [vmem:[#allocation10] sm:$0xff] %v230_v57 }
 0x339   :  { %v228_v58 = vpop.permute.xlu1 %227 }
 0x33a   :  { %v231_v59 = vsub.f32 %v413_v15, %v228_v58 }
 0x33c   :  { %233 = vst [vmem:[#allocation10 + $0x8] sm:$0xff] %v231_v59 }
 0x33d   :  { %350 = shalt.err (!%p347_p0)
}
 0x33e   :  { %245 = dma.vmem_to_hbm [thread:$0]  %s240_s24, 256, %s435_s3, [#allocation7], %s366_s15, %s366_s15, %s367_s16  }
 0x33f   :  { %363 = dma.done.wait [#allocation7], 256  }
 0x340   :  { %364 = vsyncadd [#allocation7], 4294967040 }
 0x341   :  { %249 = vsyncpa [#allocation6], 1 }
 0x342   :  { %250 = vsyncpa [#allocation9], 1 }
 0x343   :  { %251 = vsyncpa [#allocation7], 1 }

</bundles_post_ra>
